<compile_context>
chip_gen: v7x
topology: tpu7x:2x2x1
jax: 0.10.0
libtpu: 0.0.40
codegen_flags: <defaults>
</compile_context>

<pallas_src>
import jax
import jax.numpy as jnp
from jax import lax
from jax.experimental import pallas as pl
from jax.experimental.pallas import tpu as pltpu


# Module-default gramo hyperparameters (GradientModification()).
_SCALING_RATIO = 1.0
_EPI = 1e-5
_DIV_ME_WHEN_G_TOO_SMALL = 1e-3


def _round_up(x, m):
    return ((x + m - 1) // m) * m


def _vmem_capacity_bytes():
    try:
        return int(pltpu.get_tpu_info().vmem_capacity_bytes)
    except Exception:
        return 64 * 1024 * 1024          # conservative fallback: v7x per-TC VMEM


def _tile_footprint_bytes(tm, tk, tn, in_bytes):
    # Double-buffered x / W / bias / output tiles.
    return 2 * (tm * tk * in_bytes + tn * tk * in_bytes + tn * 4 + tm * tn * 4)


def _pick_tile(dim, cap):
    # Prefer 256-aligned tiles (v6e/v7x MXU is 2x256x256) when the dim is big
    # enough; 128 otherwise (v5e's 4x128x128 is happy with 128 alignment).
    t = _round_up(dim, 128)
    if t >= 256:
        t = _round_up(dim, 256)
    return min(t, cap)


def _linear_gramo_kernel(x_ref, w_ref, b_ref, o_ref):
    """One (tm, tn) output tile; reduction over the last (K) grid axis.

    x_ref: (tm, tk), w_ref: (tn, tk) in native [OUT, IN] layout (the MXU
    contracts the transposed RHS directly), b_ref: (1, tn) f32,
    o_ref: (tm, tn) f32 -- resident across k, used as the accumulator.
    """
    k = pl.program_id(2)

    part = lax.dot_general(
        x_ref[...], w_ref[...],
        dimension_numbers=(((1,), (1,)), ((), ())),
        preferred_element_type=jnp.float32)

    @pl.when(k == 0)
    def _():
        # Bias folded into the first-k init; no zero-init / copy epilogue.
        o_ref[...] = part + b_ref[...]

    @pl.when(k > 0)
    def _():
        o_ref[...] += part


def linear_gramo_forward(x, w, b, mxu_dtype=jnp.bfloat16):
    """Forward of Linear_gramo: y = x @ w.T + b (gramo forward is identity).

    x: [B, IN] f32, w: [OUT, IN] f32 (native PyTorch layout -- NOT transposed),
    b: [OUT] f32.  Returns [B, OUT] f32.

    The matmul runs on the MXU in `mxu_dtype` (bf16 default) with f32
    accumulation -- a deliberate mixed-precision choice; pass jnp.float32 for
    exact f32 parity with the PyTorch module.
    """
    B, IN = x.shape
    OUT, IN2 = w.shape
    assert IN == IN2 and b.shape == (OUT,)

    in_bytes = jnp.dtype(mxu_dtype).itemsize
    vmem_cap = _vmem_capacity_bytes()
    budget = min(int(vmem_cap * 3 // 4), 96 * 1024 * 1024)

    # Tile sizes: tm multiple of 16 (bf16 sublane packing), tk/tn 128/256
    # aligned.  Start big, shrink to the per-generation VMEM budget.
    tm = min(_round_up(B, 16), 512)
    tk = _pick_tile(IN, 1024)
    tn = _pick_tile(OUT, 1024)
    while _tile_footprint_bytes(tm, tk, tn, in_bytes) > budget:
        if tk >= tn and tk > 128:
            tk = _round_up(tk // 2, 128)
        elif tn > 128:
            tn = _round_up(tn // 2, 128)
        elif tm > 16:
            tm = _round_up(tm // 2, 16)
        else:
            break

    Mp = _round_up(B, tm)
    Np = _round_up(OUT, tn)
    # v7x has 2 TensorCores: make sure the "parallel" grid axes provide >= 2
    # iterations whenever the problem is large enough to split.
    if (Mp // tm) * (Np // tn) < 2 and Np > 128:
        tn = _round_up(Np // 2, 128)
        Np = _round_up(OUT, tn)
    Kp = _round_up(IN, tk)

    # Lane-dense zero padding (zeros don't change the matmul).  W stays in its
    # native [OUT, IN] layout -- no wrapper-side transpose.  Pads and the
    # output slice are skipped when shapes are already tile-aligned.
    # TODO(synk): for repeated calls with fixed parameters, pre-cast/pre-pad W
    # and b once outside this function and reuse them across steps.
    def pad2(a, rows, cols, dtype):
        a = a.astype(dtype)
        if a.shape == (rows, cols):
            return a
        return jnp.zeros((rows, cols), dtype).at[:a.shape[0], :a.shape[1]].set(a)

    x_p = pad2(x, Mp, Kp, mxu_dtype)
    w_p = pad2(w, Np, Kp, mxu_dtype)
    b_p = pad2(b.reshape(1, OUT), 1, Np, jnp.float32)

    grid = (Mp // tm, Np // tn, Kp // tk)

    footprint = _tile_footprint_bytes(tm, tk, tn, in_bytes)
    vmem_limit = None
    if footprint > 16 * 1024 * 1024:          # v5e scoped default
        vmem_limit = min(int(footprint * 3 // 2), vmem_cap - 4 * 1024 * 1024)

    y_p = pl.pallas_call(
        _linear_gramo_kernel,
        out_shape=jax.ShapeDtypeStruct((Mp, Np), jnp.float32),
        grid_spec=pltpu.PrefetchScalarGridSpec(
            num_scalar_prefetch=0,
            grid=grid,
            in_specs=[
                pl.BlockSpec((tm, tk), lambda i, j, k: (i, k)),
                pl.BlockSpec((tn, tk), lambda i, j, k: (j, k)),   # native [OUT, IN]
                pl.BlockSpec((1, tn), lambda i, j, k: (0, j)),
            ],
            out_specs=pl.BlockSpec((tm, tn), lambda i, j, k: (i, j)),
        ),
        compiler_params=pltpu.CompilerParams(
            dimension_semantics=("parallel", "parallel", "arbitrary"),
            vmem_limit_bytes=vmem_limit,
        ),
    )(x_p, w_p, b_p)

    if (Mp, Np) == (B, OUT):
        return y_p
    return y_p[:B, :OUT]


# ---- custom_vjp reproducing GradientModificationFunction.backward ----------
@jax.custom_vjp
def linear_gramo(x, w, b):
    return linear_gramo_forward(x, w, b)


def _linear_gramo_fwd(x, w, b):
    y = linear_gramo_forward(x, w, b)
    return y, (x, w)


def _linear_gramo_bwd(res, g):
    # Gradients are taken wrt the f32 parameters (standard mixed-precision
    # practice: bf16 forward, f32 backward math).
    # TODO(synk): backward gradient rescale is plain JAX here, not a fused
    # Pallas kernel (shapes are tiny; a fused kernel would only matter at scale).
    x, w = res
    length = jnp.sqrt(jnp.sum(g * g, axis=1))
    too_small = (length <= _EPI).astype(jnp.float32)
    div_me = length * (1.0 - too_small) + _DIV_ME_WHEN_G_TOO_SMALL * too_small
    g_mod = g / div_me[:, None]
    if _SCALING_RATIO != 1.0:
        g_mod = g_mod * _SCALING_RATIO
    dx = g_mod @ w               # [B, OUT] @ [OUT, IN] -> [B, IN]
    dw = g_mod.T @ x             # [OUT, B] @ [B, IN]  -> [OUT, IN]
    db = jnp.sum(g_mod, axis=0)  # [OUT]
    return dx, dw, db


linear_gramo.defvjp(_linear_gramo_fwd, _linear_gramo_bwd)


if __name__ == "__main__":
    # Small shapes consistent with the module: rank-2 input [batch, in_features].
    batch, in_features, out_features = 8, 32, 16

    key = jax.random.PRNGKey(0)
    kx, kw, kb = jax.random.split(key, 3)

    # Deterministic parameter init (mirrors torch.nn.Linear's uniform range).
    bound = 1.0 / (in_features ** 0.5)
    w = jax.random.uniform(kw, (out_features, in_features),
                           minval=-bound, maxval=bound, dtype=jnp.float32)
    b = jax.random.uniform(kb, (out_features,),
                           minval=-bound, maxval=bound, dtype=jnp.float32)
    x = jax.random.normal(kx, (batch, in_features), dtype=jnp.float32)

    y = linear_gramo(x, w, b)
    y = jax.block_until_ready(y)
    assert y.shape == (batch, out_features)

    # Reference 1: same bf16-input / f32-accumulate matmul in plain JAX.
    y_ref_bf16 = jnp.dot(x.astype(jnp.bfloat16),
                         jnp.transpose(w).astype(jnp.bfloat16),
                         preferred_element_type=jnp.float32) + b
    assert jnp.allclose(y, y_ref_bf16, atol=1e-3, rtol=1e-3)

    # Reference 2: exact f32 module semantics (loose tol: bf16 MXU rounding).
    y_ref_f32 = x @ w.T + b
    assert jnp.allclose(y, y_ref_f32, atol=5e-2, rtol=5e-2)

    # Backward path (gramo per-row gradient rescale) via the custom_vjp.
    grads = jax.grad(lambda xx, ww, bb: jnp.sum(linear_gramo(xx, ww, bb)),
                     argnums=(0, 1, 2))(x, w, b)
    grads = jax.block_until_ready(grads)
    assert grads[0].shape == x.shape
    assert grads[1].shape == w.shape
    assert grads[2].shape == b.shape
    assert all(bool(jnp.all(jnp.isfinite(g))) for g in grads)

    print("KERNEL_OK")
</pallas_src>

<mosaic_0001>
module attributes {stable_mosaic.version = 11 : i64} {
  func.func @_linear_gramo_kernel(%arg0: i32, %arg1: i32, %arg2: i32, %arg3: memref<16x128xbf16, #tpu.memory_space<vmem>>, %arg4: memref<128x128xbf16, #tpu.memory_space<vmem>>, %arg5: memref<1x128xf32, #tpu.memory_space<vmem>>, %arg6: memref<16x128xf32, #tpu.memory_space<vmem>>) attributes {dimension_semantics = [#tpu.dimension_semantics<parallel>, #tpu.dimension_semantics<parallel>, #tpu.dimension_semantics<arbitrary>], iteration_bounds = array<i64: 1, 1, 1>, scalar_prefetch = 0 : i64, scratch_operands = 0 : i64, tpu.core_type = #tpu.core_type<tc>, window_params = [{transform_indices = @transform_0, window_bounds = array<i64: 16, 128>}, {transform_indices = @transform_1, window_bounds = array<i64: 128, 128>}, {transform_indices = @transform_2, window_bounds = array<i64: 1, 128>}, {transform_indices = @transform_3, window_bounds = array<i64: 16, 128>}]} {
    %c0 = arith.constant 0 : index
    %c0_0 = arith.constant 0 : index
    %0 = vector.load %arg3[%c0, %c0_0] : memref<16x128xbf16, #tpu.memory_space<vmem>>, vector<16x128xbf16>
    %c0_1 = arith.constant 0 : index
    %c0_2 = arith.constant 0 : index
    %1 = vector.load %arg4[%c0_1, %c0_2] : memref<128x128xbf16, #tpu.memory_space<vmem>>, vector<128x128xbf16>
    %cst = arith.constant dense<0.000000e+00> : vector<16x128xf32>
    %2 = tpu.matmul %0, %1, %cst {dimension_numbers = #tpu.dot_dimension_numbers<[1], [1], [0], [0], [0, 0, 1, 0], [], []>} : vector<16x128xbf16>, vector<128x128xbf16>, vector<16x128xf32> -> vector<16x128xf32>
    %c0_i32 = arith.constant 0 : i32
    %3 = arith.cmpi eq, %arg2, %c0_i32 : i32
    %4 = arith.extui %3 : i1 to i32
    %c0_i32_3 = arith.constant 0 : i32
    %5 = arith.cmpi ne, %4, %c0_i32_3 : i32
    scf.if %5 {
      %c0_6 = arith.constant 0 : index
      %c0_7 = arith.constant 0 : index
      %9 = vector.load %arg5[%c0_6, %c0_7] : memref<1x128xf32, #tpu.memory_space<vmem>>, vector<1x128xf32>
      %10 = vector.broadcast %9 : vector<1x128xf32> to vector<16x128xf32>
      %11 = arith.addf %2, %10 : vector<16x128xf32>
      %c0_8 = arith.constant 0 : index
      %c0_9 = arith.constant 0 : index
      %12 = vector.load %arg6[%c0_8, %c0_9] : memref<16x128xf32, #tpu.memory_space<vmem>>, vector<16x128xf32>
      tpu.vector_store %arg6[%c0_8, %c0_9], %11 {strides = array<i32>} : memref<16x128xf32, #tpu.memory_space<vmem>>, vector<16x128xf32>,
    } else {
    }
    %c0_i32_4 = arith.constant 0 : i32
    %6 = arith.cmpi sgt, %arg2, %c0_i32_4 : i32
    %7 = arith.extui %6 : i1 to i32
    %c0_i32_5 = arith.constant 0 : i32
    %8 = arith.cmpi ne, %7, %c0_i32_5 : i32
    scf.if %8 {
      %c0_6 = arith.constant 0 : index
      %c0_7 = arith.constant 0 : index
      %9 = vector.load %arg6[%c0_6, %c0_7] : memref<16x128xf32, #tpu.memory_space<vmem>>, vector<16x128xf32>
      %10 = arith.addf %9, %2 : vector<16x128xf32>
      %c0_8 = arith.constant 0 : index
      %c0_9 = arith.constant 0 : index
      %11 = vector.load %arg6[%c0_8, %c0_9] : memref<16x128xf32, #tpu.memory_space<vmem>>, vector<16x128xf32>
      tpu.vector_store %arg6[%c0_8, %c0_9], %10 {strides = array<i32>} : memref<16x128xf32, #tpu.memory_space<vmem>>, vector<16x128xf32>,
    } else {
    }
    return
  }
  func.func @transform_0(%arg0: i32, %arg1: i32, %arg2: i32) -> (i32, i32) {
    %c0_i32 = arith.constant 0 : i32
    return %arg0, %arg2 : i32, i32
  }
  func.func @transform_1(%arg0: i32, %arg1: i32, %arg2: i32) -> (i32, i32) {
    %c0_i32 = arith.constant 0 : i32
    return %arg1, %arg2 : i32, i32
  }
  func.func @transform_2(%arg0: i32, %arg1: i32, %arg2: i32) -> (i32, i32) {
    %c0_i32 = arith.constant 0 : i32
    %c0_i32_0 = arith.constant 0 : i32
    return %c0_i32, %arg1 : i32, i32
  }
  func.func @transform_3(%arg0: i32, %arg1: i32, %arg2: i32) -> (i32, i32) {
    %c0_i32 = arith.constant 0 : i32
    return %arg0, %arg1 : i32, i32
  }
}

</mosaic_0001>

<bundles_post_ra>
// kernel: tpu_custom_call.1
= control target key start
LH: loop header
LB: loop body
LE: loop exit
PB: predicated region body
PF: predicated region fallthrough
CT: control target
= control target key end

     0   :  { %8 = vsyncpa [#allocation3], 0  ;;  %s397_s0 = inlined_call_operand.hbm [shape: bf16[16,128], index: 0, kind: input, shape index: {}]   ;;  %s398_s1 = inlined_call_operand.hbm [shape: bf16[128,128], index: 1, kind: input, shape index: {}]   ;;  %s399_s2 = inlined_call_operand.vmem [shape: f32[1,128], index: 2, kind: input, shape index: {}]   ;;  %s400_s3 = inlined_call_operand.hbm [shape: f32[16,128], index: 3, kind: output, shape index: {}]  }
   0x1   :  { %9 = vsyncpa [#allocation6], 0 }
   0x2   :  { %10 = vsyncpa [#allocation4], 0  ;;  %s329_s12 = smov [#allocation2]   ;;  %s257_s16 = scalar_lea.hbm %s397_s0, 128 }
   0x3   :  { %s16_s13 = sshll.u32 %s329_s12, 4  ;;  %p258_p0 = scmp.ne.s32.totalorder %s397_s0, %s257_s16  ;;  %s17_s13 = int_to_ptr.vmem [resolvable:$true] %s16_s13 }
   0x4   :  { %p261_p1 = scmp.lt.u32.totalorder %s257_s16, %s397_s0 }
   0x6   :  { %p263_p2 = pnand %p261_p1, %p258_p0 }
   0x8   :  { %266 = shalt.err (!%p263_p2)
}
   0x9   :  { %s267_s21 = scalar_lea.vmem %s17_s13, 128  ;;  %p272_p4 = scmp.lt.s32.totalorder %s17_s13, %s17_s13 }
   0xa   :  { %p268_p3 = scmp.ne.s32.totalorder %s17_s13, %s267_s21  ;;  %p273_p5 = scmp.lt.s32.totalorder %s267_s21, %s267_s21 }
   0xc   :  { %p274_p6 = por %p273_p5, %p272_p4 }
   0xe   :  { %p275_p7 = pnand %p274_p6, %p268_p3 }
  0x10   :  { %278 = shalt.err (!%p275_p7)
}
  0x11   :  { %s330_s22 = smov 64   ;;  %s331_s23 = smov 4  }
  0x12   :  { %22 = dma.hbm_to_vmem [thread:$0]  %s397_s0, 128, %s17_s13, [#allocation3], %s330_s22, %s330_s22, %s331_s23  }
  0x13   :  { %s332_s26 = smov [#allocation5]   ;;  %s279_s30 = scalar_lea.hbm %s398_s1, 1024 }
  0x14   :  { %s28_s27 = sshll.u32 %s332_s26, 4  ;;  %p280_p8 = scmp.ne.s32.totalorder %s398_s1, %s279_s30  ;;  %s29_s27 = int_to_ptr.vmem [resolvable:$true] %s28_s27 }
  0x15   :  { %p283_p9 = scmp.lt.u32.totalorder %s279_s30, %s398_s1 }
  0x17   :  { %p285_p10 = pnand %p283_p9, %p280_p8 }
  0x19   :  { %288 = shalt.err (!%p285_p10)
}
  0x1a   :  { %s289_s8 = scalar_lea.vmem %s29_s27, 1024  ;;  %p294_p12 = scmp.lt.s32.totalorder %s29_s27, %s29_s27 }
  0x1b   :  { %p290_p11 = scmp.ne.s32.totalorder %s29_s27, %s289_s8  ;;  %p295_p13 = scmp.lt.s32.totalorder %s289_s8, %s289_s8 }
  0x1d   :  { %p296_p0 = por %p295_p13, %p294_p12 }
  0x1f   :  { %p297_p1 = pnand %p296_p0, %p290_p11 }
  0x21   :  { %300 = shalt.err (!%p297_p1)
}
  0x22   :  { %34 = dma.hbm_to_vmem [thread:$0]  %s398_s1, 1024, %s29_s27, [#allocation6], %s330_s22, %s330_s22, %s331_s23  }
  0x23   :  { %323 = dma.done.wait [#allocation3], 128  }
  0x24   :  { %324 = vsyncadd [#allocation3], 4294967168 }
  0x25   :  { %325 = dma.done.wait [#allocation6], 1024  }
  0x26   :  { %326 = vsyncadd [#allocation6], 4294966272  ;;  %v333_v0 = vmov 0.0   ;;  %vm334_vm0 = vmmov 0   ;;  %v248_v1 = vld [vmem:[#allocation5] sm:$0xff]   ;;  %v249_v2 = vld [vmem:[#allocation5 + $0x8] sm:$0xff]  }
  0x27   :  { %219 = vmatprep.subr.bf16.mxu0 %v333_v0  ;;  %235 = vmatprep.mubr.msk.bf16.mxu0 %vm334_vm0, %v333_v0  ;;  %v250_v3 = vld [vmem:[#allocation5 + $0x10] sm:$0xff]   ;;  %v251_v4 = vld [vmem:[#allocation5 + $0x18] sm:$0xff]   ;;  %v252_v5 = vld [vmem:[#allocation5 + $0x20] sm:$0xff]   ;;  %s335_s11 = smov [#allocation7]  }
  0x28   :  { %220 = vmatpush3.bf16.xpose.msra.mxu0 %v248_v1  ;;  %v253_v6 = vld [vmem:[#allocation5 + $0x28] sm:$0xff]   ;;  %v254_v7 = vld [vmem:[#allocation5 + $0x30] sm:$0xff]   ;;  %v255_v8 = vld [vmem:[#allocation5 + $0x38] sm:$0xff]   ;;  %s187_s12 = sshll.u32 %s335_s11, 4  ;;  %s188_s12 = int_to_ptr.vmem [resolvable:$true] %s187_s12 }
  0x29   :  { %221 = vmatprep.subr.bf16.mxu0 %v333_v0  ;;  %v256_v9 = vld [vmem:[#allocation2] sm:$0xff]   ;;  %s301_s13 = scalar_lea.vmem %s188_s12, 256  ;;  %p306_p3 = scmp.lt.s32.totalorder %s188_s12, %s188_s12 }
  0x2a   :  { %v209_v10 = vld [vmem:[%s399_s2] ss:$0 sm:$0xff]  ;;  %p302_p2 = scmp.ne.s32.totalorder %s188_s12, %s301_s13  ;;  %p307_p4 = scmp.lt.s32.totalorder %s301_s13, %s301_s13 }
  0x2c   :  { %p308_p5 = por %p307_p4, %p306_p3 }
  0x2e   :  { %p309_p6 = pnand %p308_p5, %p302_p2 }
  0x30   :  { %222 = vmatpush3.bf16.xpose.msra.mxu0 %v249_v2 }
  0x31   :  { %223 = vmatprep.subr.bf16.mxu0 %v333_v0 }
  0x38   :  { %224 = vmatpush3.bf16.xpose.msra.mxu0 %v250_v3 }
  0x39   :  { %225 = vmatprep.subr.bf16.mxu0 %v333_v0 }
  0x40   :  { %226 = vmatpush3.bf16.xpose.msra.mxu0 %v251_v4 }
  0x41   :  { %227 = vmatprep.subr.bf16.mxu0 %v333_v0 }
  0x48   :  { %228 = vmatpush3.bf16.xpose.msra.mxu0 %v252_v5 }
  0x49   :  { %229 = vmatprep.subr.bf16.mxu0 %v333_v0 }
  0x50   :  { %230 = vmatpush3.bf16.xpose.msra.mxu0 %v253_v6 }
  0x51   :  { %231 = vmatprep.subr.bf16.mxu0 %v333_v0 }
  0x58   :  { %232 = vmatpush3.bf16.xpose.msra.mxu0 %v254_v7 }
  0x59   :  { %233 = vmatprep.subr.bf16.mxu0 %v333_v0 }
  0x60   :  { %234 = vmatpush3.bf16.xpose.msra.mxu0 %v255_v8 }
  0x67   :  { %236 = vmatmul.mubr.bf16.vlgmr.msra.gmra.mrb[0].mxu0 %v256_v9 }
 0x13a   :  { %v150_v11 = vpop.f32.mrb[0].mxu0 }
 0x13b   :  { %v168_v12 = vadd.f32 %v209_v10, %v150_v11  ;;  %v237_v13 = vpop.f32.mrb[1].mxu0 }
 0x13c   :  { %v153_v14 = vpop.f32.mrb[2].mxu0 }
 0x13d   :  { %170 = vst [vmem:[#allocation7] sm:$0xff] %v168_v12  ;;  %v169_v15 = vadd.f32 %v209_v10, %v153_v14  ;;  %v238_v16 = vpop.f32.mrb[3].mxu0 }
 0x13f   :  { %171 = vst [vmem:[#allocation7 + $0x8] sm:$0xff] %v169_v15 }
 0x140   :  { %312 = shalt.err (!%p309_p6)
}
 0x141   :  { %s313_s15 = scalar_lea.hbm %s400_s3, 256 }
 0x142   :  { %p314_p7 = scmp.ne.s32.totalorder %s400_s3, %s313_s15  ;;  %p317_p8 = scmp.lt.u32.totalorder %s313_s15, %s400_s3 }
 0x144   :  { %p319_p9 = pnand %p317_p8, %p314_p7 }
 0x146   :  { %322 = shalt.err (!%p319_p9)
}
 0x147   :  { %s336_s20 = smov 128   ;;  %s337_s21 = smov 8  }
 0x148   :  { %193 = dma.vmem_to_hbm [thread:$0]  %s188_s12, 256, %s400_s3, [#allocation4], %s336_s20, %s336_s20, %s337_s21  }
 0x149   :  { %327 = dma.done.wait [#allocation4], 256  }
 0x14a   :  { %328 = vsyncadd [#allocation4], 4294967040 }
 0x14b   :  { %197 = vsyncpa [#allocation3], 1 }
 0x14c   :  { %198 = vsyncpa [#allocation6], 1 }
 0x14d   :  { %199 = vsyncpa [#allocation4], 1 }

</bundles_post_ra>
